<compile_context>
chip_gen: v7x
topology: tpu7x:2x2x1
jax: 0.10.0
libtpu: 0.0.40
codegen_flags: <defaults>
</compile_context>

<pallas_src>
import functools

import jax
import jax.numpy as jnp
from jax.experimental import pallas as pl
from jax.experimental.pallas import tpu as pltpu


def _round_up(x: int, m: int) -> int:
    return ((x + m - 1) // m) * m


def _vae_loss_kernel(kl_weight, batch_size, needs_mask,
                     xr_ref, x_ref, mu_ref, logvar_ref, out_ref, acc_ref):
    """grid = (num_split [parallel], steps [arbitrary reduction])."""
    c = pl.program_id(0)                     # split (TensorCore) index
    s = pl.program_id(1)                     # reduction step within the split
    steps = pl.num_programs(1)

    @pl.when(s == 0)
    def _init():
        acc_ref[...] = jnp.zeros_like(acc_ref)

    block_b = xr_ref.shape[0]

    xr = xr_ref[...].astype(jnp.float32)
    xt = x_ref[...].astype(jnp.float32)

    if needs_mask:
        # Global batch rows covered by this (possibly overhanging) block.
        row0 = (c * steps + s) * block_b
        rows = row0 + jax.lax.broadcasted_iota(jnp.int32, (block_b, 1), 0)
        valid = rows < batch_size
        # Neutral pair (xr = x = 1): contributes exactly 0 under the -100 clamp.
        xr = jnp.where(valid, xr, 1.0)
        xt = jnp.where(valid, xt, 1.0)

    # PyTorch BCELoss(reduction='sum') elementwise term; the log terms are
    # clamped at -100 *before* the multiply, exactly like torch.
    log_xr = jnp.maximum(jnp.log(xr), -100.0)
    log_1m = jnp.maximum(jnp.log(1.0 - xr), -100.0)
    # x*log_xr + (1-x)*log_1m  ==  x*(log_xr - log_1m) + log_1m  (fewer VPU ops)
    term = xt * (log_xr - log_1m) + log_1m

    # Fold the block down to the small (<=8, D) accumulator with VPU adds only.
    sub = acc_ref.shape[0]
    if block_b != sub:
        term = term.reshape(block_b // sub, sub, term.shape[-1]).sum(axis=0)
    acc_ref[...] += term

    @pl.when(s == steps - 1)
    def _finalize():
        bce = -jnp.sum(acc_ref[...])          # single XLU reduce, epilogue only
        mu = mu_ref[...].astype(jnp.float32)
        lv = logvar_ref[...].astype(jnp.float32)
        kl = -0.5 * jnp.sum(1.0 + lv - mu * mu - jnp.exp(lv))
        # KL is added exactly once (split 0); other splits emit only their BCE.
        kl_term = jnp.where(c == 0, jnp.float32(kl_weight) * kl,
                            jnp.float32(0.0))
        out_ref[...] = jnp.reshape(bce + kl_term, (1, 1, 1))


def vae_loss(x_reconstructed, x, mu, logvar, kl_loss_weight: float = 1.0, *,
             block_batch: int | None = None, num_split: int | None = None,
             target_block_bytes: int = 4 << 20):
    """Pallas implementation of VAELoss.forward. Returns a scalar f32."""
    B = x_reconstructed.shape[0]
    assert x.shape[0] == B

    # nn.Flatten(): (B, C, H, W) -> (B, D).  Callers holding (B, D) already
    # pay no wrapper-side copy at all.
    xr2d = x_reconstructed.reshape(B, -1)
    x2d = x.reshape(B, -1)
    assert xr2d.shape == x2d.shape
    D = xr2d.shape[1]
    mu2d = mu.reshape(1, -1)
    lv2d = logvar.reshape(1, -1)

    # --- batch-block sizing -------------------------------------------------
    lane_d = _round_up(D, 128)
    itemsize = max(xr2d.dtype.itemsize, x2d.dtype.itemsize)
    if block_batch is None:
        block_batch = max(8, ((target_block_bytes // (lane_d * itemsize)) // 8) * 8)
    if B < 8:
        block_b = B                              # block == full batch dim
    else:
        cap = (B // 8) * 8                       # largest multiple of 8 <= B
        block_b = int(min(max(8, (int(block_batch) // 8) * 8), cap))

    total_blocks = pl.cdiv(B, block_b)
    if num_split is None:
        num_split = 2 if total_blocks >= 2 else 1   # v7x: one partial per TC
    num_split = max(1, min(int(num_split), total_blocks))
    steps = pl.cdiv(total_blocks, num_split)
    grid = (num_split, steps)

    needs_mask = (B % block_b != 0) or (num_split * steps != total_blocks)
    acc_rows = 8 if block_b % 8 == 0 else block_b
    last_block = total_blocks - 1

    def img_map(c, s):
        # Clamp so overhanging grid cells issue an in-bounds DMA; their rows
        # are masked out in-kernel, so nothing is double counted.
        return (jnp.minimum(c * steps + s, last_block), 0)

    n = B * D
    cost = pl.CostEstimate(
        flops=6 * n + 5 * mu2d.size,
        transcendentals=2 * n + mu2d.size,
        bytes_accessed=n * (xr2d.dtype.itemsize + x2d.dtype.itemsize)
        + mu2d.size * mu2d.dtype.itemsize
        + lv2d.size * lv2d.dtype.itemsize
        + num_split * 4,
    )

    kernel = functools.partial(_vae_loss_kernel, float(kl_loss_weight), B,
                               needs_mask)
    out = pl.pallas_call(
        kernel,
        out_shape=jax.ShapeDtypeStruct((num_split, 1, 1), jnp.float32),
        grid_spec=pltpu.PrefetchScalarGridSpec(
            num_scalar_prefetch=0,
            grid=grid,
            in_specs=[
                pl.BlockSpec((block_b, D), img_map),
                pl.BlockSpec((block_b, D), img_map),
                # Tiny mu / logvar stay resident (same block every step).
                pl.BlockSpec(mu2d.shape, lambda c, s: (0, 0)),
                pl.BlockSpec(lv2d.shape, lambda c, s: (0, 0)),
            ],
            out_specs=pl.BlockSpec((1, 1, 1), lambda c, s: (c, 0, 0)),
            scratch_shapes=[pltpu.VMEM((acc_rows, D), jnp.float32)],
        ),
        compiler_params=pltpu.CompilerParams(
            dimension_semantics=("parallel", "arbitrary"),
            # 2 inputs x 2 pipeline buffers x <=4 MiB + small scratch fits
            # comfortably; explicit limit covers v5e's 16 MiB scoped default
            # while staying well inside v7x's 64 MiB physical VMEM.
            vmem_limit_bytes=40 * 1024 * 1024,
        ),
        cost_estimate=cost,
    )(xr2d, x2d, mu2d, lv2d)

    # Combine the per-split partials (KL was folded into split 0 exactly once).
    return jnp.sum(out)


def _vae_loss_ref(x_reconstructed, x, mu, logvar, kl_loss_weight=1.0):
    """Pure-JAX reference mirroring torch semantics."""
    b = x_reconstructed.shape[0]
    xr = x_reconstructed.reshape(b, -1).astype(jnp.float32)
    xf = x.reshape(b, -1).astype(jnp.float32)
    log_xr = jnp.maximum(jnp.log(xr), -100.0)
    log_1m = jnp.maximum(jnp.log(1.0 - xr), -100.0)
    bce = -jnp.sum(xf * log_xr + (1.0 - xf) * log_1m)
    kl = -0.5 * jnp.sum(1.0 + logvar - mu ** 2 - jnp.exp(logvar))
    return bce + kl * kl_loss_weight


if __name__ == "__main__":
    key = jax.random.PRNGKey(0)
    k1, k2, k3, k4 = jax.random.split(key, 4)

    batch, channels, height, width = 2, 1, 28, 28   # MNIST-like
    latent = 16
    kl_loss_weight = 0.5

    # Reconstruction must lie in (0, 1) for BCE (decoder ends in sigmoid).
    x_reconstructed = jax.nn.sigmoid(
        jax.random.normal(k1, (batch, channels, height, width), jnp.float32))
    x = jax.random.uniform(k2, (batch, channels, height, width), jnp.float32)
    mu = jax.random.normal(k3, (batch, latent), jnp.float32)
    logvar = 0.1 * jax.random.normal(k4, (batch, latent), jnp.float32)

    ref = _vae_loss_ref(x_reconstructed, x, mu, logvar, kl_loss_weight)
    loss = vae_loss(x_reconstructed, x, mu, logvar, kl_loss_weight)
    jax.block_until_ready(loss)
    assert jnp.allclose(loss, ref, rtol=1e-5, atol=1e-3), (loss, ref)

    # Larger, ragged batch: exercises the 2-way core split, multi-step
    # accumulation and masked overhang blocks.
    kb1, kb2, kb3, kb4 = jax.random.split(jax.random.PRNGKey(1), 4)
    B2 = 20
    xr2 = jax.nn.sigmoid(jax.random.normal(kb1, (B2, 1, 28, 28), jnp.float32))
    xt2 = jax.random.uniform(kb2, (B2, 1, 28, 28), jnp.float32)
    mu2 = jax.random.normal(kb3, (B2, latent), jnp.float32)
    lv2 = 0.1 * jax.random.normal(kb4, (B2, latent), jnp.float32)
    ref2 = _vae_loss_ref(xr2, xt2, mu2, lv2, kl_loss_weight)

    loss2 = vae_loss(xr2, xt2, mu2, lv2, kl_loss_weight, block_batch=8)
    jax.block_until_ready(loss2)
    assert jnp.allclose(loss2, ref2, rtol=1e-5, atol=1e-2), (loss2, ref2)

    # 16-row blocks: exercises the >8-row VPU fold into the (8, D) accumulator.
    loss3 = vae_loss(xr2, xt2, mu2, lv2, kl_loss_weight, block_batch=16)
    jax.block_until_ready(loss3)
    assert jnp.allclose(loss3, ref2, rtol=1e-5, atol=1e-2), (loss3, ref2)

    # bf16 images through HBM (halved bandwidth); f32 accumulation in-kernel.
    xr_bf = xr2.astype(jnp.bfloat16)
    xt_bf = xt2.astype(jnp.bfloat16)
    ref_bf = _vae_loss_ref(xr_bf.astype(jnp.float32), xt_bf.astype(jnp.float32),
                           mu2, lv2, kl_loss_weight)
    loss_bf = vae_loss(xr_bf, xt_bf, mu2, lv2, kl_loss_weight, block_batch=8)
    jax.block_until_ready(loss_bf)
    assert jnp.allclose(loss_bf, ref_bf, rtol=1e-5, atol=1e-2), (loss_bf, ref_bf)

    print("KERNEL_OK")
</pallas_src>

<mosaic_0001>
module attributes {stable_mosaic.version = 11 : i64} {
  func.func @_vae_loss_kernel(%arg0: i32, %arg1: i32, %arg2: memref<2x784xf32, #tpu.memory_space<vmem>>, %arg3: memref<2x784xf32, #tpu.memory_space<vmem>>, %arg4: memref<1x32xf32, #tpu.memory_space<vmem>>, %arg5: memref<1x32xf32, #tpu.memory_space<vmem>>, %arg6: memref<1x1x1xf32, #tpu.memory_space<vmem>>, %arg7: memref<2x784xf32, #tpu.memory_space<vmem>>) attributes {dimension_semantics = [#tpu.dimension_semantics<parallel>, #tpu.dimension_semantics<arbitrary>], iteration_bounds = array<i64: 1, 1>, scalar_prefetch = 0 : i64, scratch_operands = 1 : i64, tpu.core_type = #tpu.core_type<tc>, window_params = [{transform_indices = @transform_0, window_bounds = array<i64: 2, 784>}, {transform_indices = @transform_1, window_bounds = array<i64: 2, 784>}, {pipeline_mode = #tpu.pipeline_mode<synchronous>, transform_indices = @transform_2, window_bounds = array<i64: 1, 32>}, {pipeline_mode = #tpu.pipeline_mode<synchronous>, transform_indices = @transform_3, window_bounds = array<i64: 1, 32>}, {transform_indices = @transform_4, window_bounds = array<i64: 1, 1, 1>}]} {
    %c0_i32 = arith.constant 0 : i32
    %0 = arith.cmpi eq, %arg1, %c0_i32 : i32
    %1 = arith.extui %0 : i1 to i32
    %c0_i32_0 = arith.constant 0 : i32
    %2 = arith.cmpi ne, %1, %c0_i32_0 : i32
    scf.if %2 {
      %cst_12 = arith.constant 0.000000e+00 : f32
      %22 = vector.broadcast %cst_12 : f32 to vector<2x784xf32>
      %c0_13 = arith.constant 0 : index
      %c0_14 = arith.constant 0 : index
      %23 = vector.load %arg7[%c0_13, %c0_14] : memref<2x784xf32, #tpu.memory_space<vmem>>, vector<2x784xf32>
      tpu.vector_store %arg7[%c0_13, %c0_14], %22 {strides = array<i32>} : memref<2x784xf32, #tpu.memory_space<vmem>>, vector<2x784xf32>,
    } else {
    }
    %c0 = arith.constant 0 : index
    %c0_1 = arith.constant 0 : index
    %3 = vector.load %arg2[%c0, %c0_1] : memref<2x784xf32, #tpu.memory_space<vmem>>, vector<2x784xf32>
    %c0_2 = arith.constant 0 : index
    %c0_3 = arith.constant 0 : index
    %4 = vector.load %arg3[%c0_2, %c0_3] : memref<2x784xf32, #tpu.memory_space<vmem>>, vector<2x784xf32>
    %5 = math.log %3 : vector<2x784xf32>
    %cst = arith.constant -1.000000e+02 : f32
    %6 = vector.broadcast %cst : f32 to vector<2x784xf32>
    %7 = arith.maximumf %5, %6 : vector<2x784xf32>
    %cst_4 = arith.constant 1.000000e+00 : f32
    %8 = vector.broadcast %cst_4 : f32 to vector<2x784xf32>
    %9 = arith.subf %8, %3 : vector<2x784xf32>
    %10 = math.log %9 : vector<2x784xf32>
    %cst_5 = arith.constant -1.000000e+02 : f32
    %11 = vector.broadcast %cst_5 : f32 to vector<2x784xf32>
    %12 = arith.maximumf %10, %11 : vector<2x784xf32>
    %13 = arith.subf %7, %12 : vector<2x784xf32>
    %14 = arith.mulf %4, %13 : vector<2x784xf32>
    %15 = arith.addf %14, %12 : vector<2x784xf32>
    %c0_6 = arith.constant 0 : index
    %c0_7 = arith.constant 0 : index
    %16 = vector.load %arg7[%c0_6, %c0_7] : memref<2x784xf32, #tpu.memory_space<vmem>>, vector<2x784xf32>
    %17 = arith.addf %16, %15 : vector<2x784xf32>
    %c0_8 = arith.constant 0 : index
    %c0_9 = arith.constant 0 : index
    %18 = vector.load %arg7[%c0_8, %c0_9] : memref<2x784xf32, #tpu.memory_space<vmem>>, vector<2x784xf32>
    tpu.vector_store %arg7[%c0_8, %c0_9], %17 {strides = array<i32>} : memref<2x784xf32, #tpu.memory_space<vmem>>, vector<2x784xf32>,
    %c0_i32_10 = arith.constant 0 : i32
    %19 = arith.cmpi eq, %arg1, %c0_i32_10 : i32
    %20 = arith.extui %19 : i1 to i32
    %c0_i32_11 = arith.constant 0 : i32
    %21 = arith.cmpi ne, %20, %c0_i32_11 : i32
    scf.if %21 {
      %c0_12 = arith.constant 0 : index
      %c0_13 = arith.constant 0 : index
      %22 = vector.load %arg7[%c0_12, %c0_13] : memref<2x784xf32, #tpu.memory_space<vmem>>, vector<2x784xf32>
      %23 = vector.shape_cast %22 : vector<2x784xf32> to vector<1x2x784xf32>
      %cst_14 = arith.constant dense<0.000000e+00> : vector<1xf32>
      %24 = vector.multi_reduction <add>, %23, %cst_14 [1, 2] : vector<1x2x784xf32> to vector<1xf32>
      %25 = vector.shape_cast %24 : vector<1xf32> to vector<1x1x1xf32>
      %26 = vector.extract %25[0, 0, 0] : f32 from vector<1x1x1xf32>
      %cst_15 = arith.constant 0.000000e+00 : f32
      %27 = arith.subf %cst_15, %26 : f32
      %c0_16 = arith.constant 0 : index
      %c0_17 = arith.constant 0 : index
      %28 = vector.load %arg4[%c0_16, %c0_17] : memref<1x32xf32, #tpu.memory_space<vmem>>, vector<1x32xf32>
      %c0_18 = arith.constant 0 : index
      %c0_19 = arith.constant 0 : index
      %29 = vector.load %arg5[%c0_18, %c0_19] : memref<1x32xf32, #tpu.memory_space<vmem>>, vector<1x32xf32>
      %cst_20 = arith.constant 1.000000e+00 : f32
      %30 = vector.broadcast %cst_20 : f32 to vector<1x32xf32>
      %31 = arith.addf %30, %29 : vector<1x32xf32>
      %32 = arith.mulf %28, %28 : vector<1x32xf32>
      %33 = arith.subf %31, %32 : vector<1x32xf32>
      %34 = math.exp %29 : vector<1x32xf32>
      %35 = arith.subf %33, %34 : vector<1x32xf32>
      %36 = vector.shape_cast %35 : vector<1x32xf32> to vector<1x1x32xf32>
      %cst_21 = arith.constant dense<0.000000e+00> : vector<1xf32>
      %37 = vector.multi_reduction <add>, %36, %cst_21 [1, 2] : vector<1x1x32xf32> to vector<1xf32>
      %38 = vector.shape_cast %37 : vector<1xf32> to vector<1x1x1xf32>
      %39 = vector.extract %38[0, 0, 0] : f32 from vector<1x1x1xf32>
      %cst_22 = arith.constant -5.000000e-01 : f32
      %40 = arith.mulf %cst_22, %39 : f32
      %c0_i32_23 = arith.constant 0 : i32
      %41 = arith.cmpi eq, %arg0, %c0_i32_23 : i32
      %cst_24 = arith.constant 5.000000e-01 : f32
      %42 = arith.mulf %cst_24, %40 : f32
      %cst_25 = arith.constant 0.000000e+00 : f32
      %43 = arith.select %41, %42, %cst_25 : f32
      %44 = arith.addf %27, %43 : f32
      %45 = vector.broadcast %44 : f32 to vector<1x1x1xf32>
      %c0_26 = arith.constant 0 : index
      %c0_27 = arith.constant 0 : index
      %c0_28 = arith.constant 0 : index
      %46 = vector.load %arg6[%c0_26, %c0_27, %c0_28] : memref<1x1x1xf32, #tpu.memory_space<vmem>>, vector<1x1x1xf32>
      tpu.vector_store %arg6[%c0_26, %c0_27, %c0_28], %45 {strides = array<i32>} : memref<1x1x1xf32, #tpu.memory_space<vmem>>, vector<1x1x1xf32>,
    } else {
    }
    return
  }
  func.func @transform_0(%arg0: i32, %arg1: i32) -> (i32, i32) {
    %c1_i32 = arith.constant 1 : i32
    %0 = arith.muli %arg0, %c1_i32 : i32
    %1 = arith.addi %0, %arg1 : i32
    %c0_i32 = arith.constant 0 : i32
    %2 = arith.minsi %1, %c0_i32 : i32
    %c0_i32_0 = arith.constant 0 : i32
    %c0_i32_1 = arith.constant 0 : i32
    return %2, %c0_i32_0 : i32, i32
  }
  func.func @transform_1(%arg0: i32, %arg1: i32) -> (i32, i32) {
    %c1_i32 = arith.constant 1 : i32
    %0 = arith.muli %arg0, %c1_i32 : i32
    %1 = arith.addi %0, %arg1 : i32
    %c0_i32 = arith.constant 0 : i32
    %2 = arith.minsi %1, %c0_i32 : i32
    %c0_i32_0 = arith.constant 0 : i32
    %c0_i32_1 = arith.constant 0 : i32
    return %2, %c0_i32_0 : i32, i32
  }
  func.func @transform_2(%arg0: i32, %arg1: i32) -> (i32, i32) {
    %c0_i32 = arith.constant 0 : i32
    %c0_i32_0 = arith.constant 0 : i32
    %c0_i32_1 = arith.constant 0 : i32
    return %c0_i32, %c0_i32_0 : i32, i32
  }
  func.func @transform_3(%arg0: i32, %arg1: i32) -> (i32, i32) {
    %c0_i32 = arith.constant 0 : i32
    %c0_i32_0 = arith.constant 0 : i32
    %c0_i32_1 = arith.constant 0 : i32
    return %c0_i32, %c0_i32_0 : i32, i32
  }
  func.func @transform_4(%arg0: i32, %arg1: i32) -> (i32, i32, i32) {
    %c0_i32 = arith.constant 0 : i32
    %c0_i32_0 = arith.constant 0 : i32
    %c0_i32_1 = arith.constant 0 : i32
    return %arg0, %c0_i32, %c0_i32_0 : i32, i32, i32
  }
}

</mosaic_0001>

<bundles_post_ra>
// kernel: tpu_custom_call.1
= control target key start
LH: loop header
LB: loop body
LE: loop exit
PB: predicated region body
PF: predicated region fallthrough
CT: control target
= control target key end

     0   :  { %9 = vsyncpa [#allocation4], 0  ;;  %s403_s0 = inlined_call_operand.hbm [shape: f32[2,784], index: 0, kind: input, shape index: {}]   ;;  %s404_s1 = inlined_call_operand.hbm [shape: f32[2,784], index: 1, kind: input, shape index: {}]   ;;  %s405_s2 = inlined_call_operand.vmem [shape: f32[1,32], index: 2, kind: input, shape index: {}]   ;;  %s406_s3 = inlined_call_operand.vmem [shape: f32[1,32], index: 3, kind: input, shape index: {}]   ;;  %s407_s4 = inlined_call_operand.hbm [shape: f32[1,1,1], index: 4, kind: output, shape index: {}]  }
   0x1   :  { %10 = vsyncpa [#allocation7], 0 }
   0x2   :  { %11 = vsyncpa [#allocation5], 0  ;;  %s316_s15 = smov [#allocation3]   ;;  %s317_s17 = smov [#allocation6]  }
   0x3   :  { %s24_s16 = sshll.u32 %s316_s15, 4  ;;  %s40_s18 = sshll.u32 %s317_s17, 4  ;;  %s25_s16 = int_to_ptr.vmem [resolvable:$true] %s24_s16  ;;  %s41_s18 = int_to_ptr.vmem [resolvable:$true] %s40_s18 }
   0x4   :  { %s244_s21 = scalar_lea.hbm %s403_s0, 224 }
   0x5   :  { %p245_p0 = scmp.ne.s32.totalorder %s403_s0, %s244_s21  ;;  %p248_p1 = scmp.lt.u32.totalorder %s244_s21, %s403_s0 }
   0x7   :  { %p250_p2 = pnand %p248_p1, %p245_p0 }
   0x9   :  { %253 = shalt.err (!%p250_p2)
}
   0xa   :  { %s254_s26 = scalar_lea.vmem %s25_s16, 224  ;;  %p259_p4 = scmp.lt.s32.totalorder %s25_s16, %s25_s16 }
   0xb   :  { %p255_p3 = scmp.ne.s32.totalorder %s25_s16, %s254_s26  ;;  %p260_p5 = scmp.lt.s32.totalorder %s254_s26, %s254_s26 }
   0xd   :  { %p261_p6 = por %p260_p5, %p259_p4 }
   0xf   :  { %p262_p7 = pnand %p261_p6, %p255_p3 }
  0x11   :  { %265 = shalt.err (!%p262_p7)
}
  0x12   :  { %27 = dma.hbm_to_vmem [thread:$0]  %s403_s0, 224, %s25_s16, [#allocation4]  }
  0x13   :  { %s266_s5 = scalar_lea.hbm %s404_s1, 224 }
  0x14   :  { %p267_p8 = scmp.ne.s32.totalorder %s404_s1, %s266_s5  ;;  %p270_p9 = scmp.lt.u32.totalorder %s266_s5, %s404_s1 }
  0x16   :  { %p272_p10 = pnand %p270_p9, %p267_p8 }
  0x18   :  { %275 = shalt.err (!%p272_p10)
}
  0x19   :  { %s276_s10 = scalar_lea.vmem %s41_s18, 224  ;;  %p281_p12 = scmp.lt.s32.totalorder %s41_s18, %s41_s18 }
  0x1a   :  { %p277_p11 = scmp.ne.s32.totalorder %s41_s18, %s276_s10  ;;  %p282_p13 = scmp.lt.s32.totalorder %s276_s10, %s276_s10 }
  0x1c   :  { %p283_p0 = por %p282_p13, %p281_p12 }
  0x1e   :  { %p284_p1 = pnand %p283_p0, %p277_p11 }
  0x20   :  { %287 = shalt.err (!%p284_p1)
}
  0x21   :  { %43 = dma.hbm_to_vmem [thread:$0]  %s404_s1, 224, %s41_s18, [#allocation7]  }
  0x22   :  { %310 = dma.done.wait [#allocation4], 224  }
  0x23   :  { %311 = vsyncadd [#allocation4], 4294967072 }
  0x24   :  { %312 = dma.done.wait [#allocation7], 224  }
  0x25   :  { %313 = vsyncadd [#allocation7], 4294967072  ;;  %vm65_vm0 = vcmask 1041408   ;;  %vm66_vm1 = vcmask 1043458   ;;  %vm68_vm2 = vcmask 128004   ;;  %v318_v1 = vmov 0.0  }
  0x26   :  { %vm67_vm3 = vmor %vm66_vm1, %vm65_vm0  ;;  %v71_v2 = vld [vmem:[#allocation3] sm:$0xff]  ;;  %v72_v3 = vld [vmem:[#allocation3 + $0x8] sm:$0x3f]  ;;  %v319_v14 = vmov 1983009808   ;;  %v117_v16 = vlaneseq  ;;  %vm164_vm5 = vcmask 123904  }
  0x27   :  { %vm371_vm4 = vmor %vm68_vm2, %vm67_vm3  ;;  %234 = vlog2.f32 %v71_v2  ;;  %v81_v4 = vsub.f32 1.0, %v71_v2  ;;  %v82_v5 = vsub.f32 1.0, %v72_v3  ;;  %v115_v15 = vunpack.c.l.s4 %v319_v14  ;;  %v73_v20 = vld [vmem:[#allocation6] sm:$0xff]  ;;  %v74_v22 = vld [vmem:[#allocation6 + $0x8] sm:$0x3f]  ;;  %s320_s16 = smov [#allocation8]  }
  0x28   :  { %70 = vst.msk [vmem:[#allocation2 + $0x8] sm:$0x3f] %vm371_vm4, %v318_v1  ;;  %236 = vlog2.f32 %v72_v3  ;;  %v118_v25 = vshrl.u32 %v117_v16, 7  ;;  %v178_v29 = vld [vmem:[%s406_s3] sm:$0x1]  ;;  %vm185_vm6 = vcmask 253952  }
  0x29   :  { %238 = vlog2.f32 %v81_v4  ;;  %v116_v24 = vunpack.c.0.s8 %v115_v15  ;;  %v182_v34 = vmul.f32 1.442695, %v178_v29  ;;  %v177_v44 = vld [vmem:[%s405_s2] sm:$0x1]  ;;  %v179_v48 = vadd.f32 1.0, %v178_v29  ;;  %s210_s17 = sshll.u32 %s320_s16, 4  ;;  %s211_s17 = int_to_ptr.vmem [resolvable:$true] %s210_s17 }
  0x2a   :  { %240 = vlog2.f32 %v82_v5  ;;  %v180_v49 = vmul.f32 %v177_v44, %v177_v44  ;;  %vm202_vm7 = vcmask 0   ;;  %s288_s21 = scalar_lea.vmem %s211_s17, 16  ;;  %s292_s22 = scalar_lea.vmem %s211_s17, 32 }
  0x2b   :  { %v119_v32 = vsub.s32 %v116_v24, %v118_v25  ;;  %242 = vpow2.f32 %v182_v34  ;;  %p289_p2 = scmp.ne.s32.totalorder %s211_s17, %s288_s21  ;;  %p293_p3 = scmp.lt.s32.totalorder %s211_s17, %s211_s17 }
  0x2c   :  { %v181_v57 = vsub.f32 %v179_v48, %v180_v49  ;;  %p294_p4 = scmp.lt.s32.totalorder %s292_s22, %s288_s21 }
  0x2e   :  { %p295_p5 = por %p294_p4, %p293_p3 }
  0x2f   :  { %v96_v31 = vld [vmem:[#allocation2 + $0x8] sm:$0x3f] }
  0x30   :  { %p296_p6 = pnand %p295_p5, %p289_p2 }
  0x31   :  { %v235_v6 = vpop.eup %234 }
  0x32   :  { %v237_v7 = vpop.eup %236  ;;  %v76_v8 = vmul.f32 0.6931472, %v235_v6 }
  0x33   :  { %v239_v9 = vpop.eup %238  ;;  %v78_v10 = vmul.f32 0.6931472, %v237_v7 }
  0x34   :  { %v241_v11 = vpop.eup %240  ;;  %v79_v12 = vmax.f32 %v76_v8, -100.0  ;;  %v84_v13 = vmul.f32 0.6931472, %v239_v9 }
  0x35   :  { %v80_v17 = vmax.f32 %v78_v10, -100.0  ;;  %v86_v18 = vmul.f32 0.6931472, %v241_v11  ;;  %v243_v58 = vpop.eup %242 }
  0x36   :  { %v87_v19 = vmax.f32 %v84_v13, -100.0  ;;  %v184_v63 = vsub.f32 %v181_v57, %v243_v58 }
  0x37   :  { %v88_v21 = vmax.f32 %v86_v18, -100.0 }
  0x38   :  { %v89_v23 = vsub.f32 %v79_v12, %v87_v19  ;;  %v186_v1 = vsel %vm185_vm6, %v184_v63, 0.0 }
  0x39   :  { %v90_v26 = vsub.f32 %v80_v17, %v88_v21 }
  0x3a   :  { %v91_v27 = vmul.f32 %v89_v23, %v73_v20 }
  0x3b   :  { %v92_v28 = vmul.f32 %v90_v26, %v74_v22 }
  0x3c   :  { %v93_v30 = vadd.f32 %v91_v27, %v87_v19 }
  0x3d   :  { %v94_v33 = vadd.f32 %v92_v28, %v88_v21 }
  0x3e   :  { %v113_v36 = vcombine.high %v93_v30, %v93_v30  ;;  %v120_v37 = vrot.slane %v93_v30, %v119_v32 }
  0x3f   :  { %v98_v35 = vadd.f32 %v96_v31, %v94_v33 }
  0x40   :  { %v127_v38 = vrot.slane %v113_v36, %v119_v32  ;;  %v128_v39 = vcombine.high %v120_v37, %v120_v37  ;;  %v153_v40 = vsel %vm65_vm0, %v120_v37, 0.0 }
  0x41   :  { %105 = vst.msk [vmem:[#allocation2 + $0x8] sm:$0x3f] %vm371_vm4, %v98_v35 }
  0x42   :  { %v129_v41 = vcombine.high %v127_v38, %v127_v38  ;;  %v154_v42 = vsel %vm65_vm0, %v128_v39, 0.0  ;;  %v156_v43 = vsel %vm65_vm0, %v127_v38, 0.0 }
  0x43   :  { %v155_v45 = vadd.f32 %v154_v42, %v153_v40 }
  0x44   :  { %v158_v46 = vsel %vm65_vm0, %v129_v41, 0.0 }
  0x45   :  { %v157_v47 = vadd.f32 %v156_v43, %v155_v45 }
  0x47   :  { %v159_v53 = vadd.f32 %v158_v46, %v157_v47 }
  0x48   :  { %v110_v50 = vld [vmem:[#allocation2 + $0x8] sm:$0x3f] }
  0x49   :  { %v130_v51 = vcombine.high %v110_v50, %v110_v50  ;;  %v137_v52 = vrot.slane %v110_v50, %v119_v32 }
  0x4b   :  { %v144_v54 = vrot.slane %v130_v51, %v119_v32  ;;  %v145_v55 = vcombine.high %v137_v52, %v137_v52  ;;  %v160_v56 = vsel %vm65_vm0, %v137_v52, 0.0 }
  0x4c   :  { %v161_v59 = vadd.f32 %v160_v56, %v159_v53 }
  0x4d   :  { %v162_v60 = vsel %vm65_vm0, %v145_v55, 0.0  ;;  %v165_v61 = vsel %vm164_vm5, %v144_v54, 0.0 }
  0x4e   :  { %v163_v62 = vadd.f32 %v162_v60, %v161_v59 }
  0x50   :  { %v166_v0 = vadd.f32 %v165_v61, %v163_v62 }
  0x52   :  { %167 = vadd.xlane.f32.xlu0 %v166_v0 }
  0x56   :  { %187 = vadd.xlane.f32.xlu0 %v186_v1 }
  0xdf   :  { %v168_v2 = vpop.xlane.xlu0 %167 }
  0xe0   :  { %v169_v3 = vrot.slane %v168_v2, 4 }
  0xe2   :  { %v170_v4 = vadd.f32 %v169_v3, %v168_v2 }
  0xe3   :  { %v188_v5 = vpop.xlane.xlu0 %187 }
  0xe4   :  { %v171_v6 = vrot.slane %v170_v4, 2  ;;  %v189_v7 = vrot.slane %v188_v5, 4 }
  0xe6   :  { %v190_v8 = vadd.f32 %v189_v7, %v188_v5  ;;  %v172_v9 = vadd.f32 %v171_v6, %v170_v4 }
  0xe8   :  { %v191_v10 = vrot.slane %v190_v8, 2  ;;  %v173_v11 = vrot.slane %v172_v9, 1 }
  0xea   :  { %v192_v12 = vadd.f32 %v191_v10, %v190_v8  ;;  %v174_v13 = vadd.f32 %v173_v11, %v172_v9 }
  0xec   :  { %224 = vpush %v174_v13  ;;  %v193_v14 = vrot.slane %v192_v12, 1 }
  0xee   :  { %v194_v15 = vadd.f32 %v193_v14, %v192_v12 }
  0xf0   :  { %226 = vpush %v194_v15 }
 0x11d   :  { %s225_s2 = spop %224 }
 0x11e   :  { %s176_s18 = ssub.f32 0.0, %s225_s2 }
 0x121   :  { %s227_s14 = spop %226 }
 0x122   :  { %s196_s15 = smul.f32 -0.5, %s227_s14 }
 0x124   :  { %s198_s19 = smul.f32 0.5, %s196_s15 }
 0x126   :  { %s200_s20 = sadd.f32 %s198_s19, %s176_s18 }
 0x128   :  { %v201_v16 = vstv %s200_s20 }
 0x129   :  { %203 = vst.msk [vmem:[#allocation8] sm:$0x1] %vm202_vm7, %v201_v16 }
 0x12a   :  { %299 = shalt.err (!%p296_p6)
}
 0x12b   :  { %s300_s25 = scalar_lea.hbm %s407_s4, 16 }
 0x12c   :  { %p301_p7 = scmp.ne.s32.totalorder %s407_s4, %s300_s25  ;;  %p304_p8 = scmp.lt.u32.totalorder %s300_s25, %s407_s4 }
 0x12e   :  { %p306_p9 = pnand %p304_p8, %p301_p7 }
 0x130   :  { %309 = shalt.err (!%p306_p9)
}
 0x131   :  { %213 = dma.vmem_to_hbm [thread:$0]  %s211_s17, 16, %s407_s4, [#allocation5]  }
 0x132   :  { %314 = dma.done.wait [#allocation5], 16  }
 0x133   :  { %315 = vsyncadd [#allocation5], 4294967280 }
 0x134   :  { %217 = vsyncpa [#allocation4], 1 }
 0x135   :  { %218 = vsyncpa [#allocation7], 1 }
 0x136   :  { %219 = vsyncpa [#allocation5], 1 }

</bundles_post_ra>
